<compile_context>
chip_gen: v6e
topology: v6e:2x2x1
jax: 0.10.0
libtpu: 0.0.40
codegen_flags: <defaults>
</compile_context>

<pallas_src>
import functools

import jax
import jax.numpy as jnp
from jax import lax
from jax.experimental import pallas as pl
from jax.experimental.pallas import tpu as pltpu

_MiB = 1024 * 1024


# ---------------------------------------------------------------------------
# Chip detection / tile sizing / VMEM budgeting
# ---------------------------------------------------------------------------

def _round_up(x, m):
    return ((x + m - 1) // m) * m


def _chip_info():
    """Best-effort (num_tensorcores, physical_vmem_bytes); safe fallbacks."""
    num_cores, vmem_cap = 1, 128 * _MiB
    try:
        info_fn = getattr(pltpu, "get_tpu_info", None)
        if info_fn is not None:
            info = info_fn()
            vmem_cap = int(getattr(info, "vmem_capacity_bytes", vmem_cap))
            for attr in ("num_cores", "num_tensorcores", "tensorcore_count",
                         "cores_per_chip"):
                v = getattr(info, attr, None)
                if v:
                    num_cores = int(v)
                    break
    except Exception:
        pass
    try:
        kind = jax.devices()[0].device_kind.lower()
        if "v7" in kind or "7x" in kind:          # v7x: 2 TCs, 64 MiB VMEM
            num_cores = max(num_cores, 2)
            vmem_cap = min(vmem_cap, 64 * _MiB)
    except Exception:
        pass
    return max(1, min(2, num_cores)), vmem_cap


def _pick_tile_n(n, k, in_bytes, num_cores):
    """Row-tile size. ~2 MiB per input block on v5e/v6e, ~4 MiB on v7x
    (3.2 TB/s HBM needs bigger blocks to amortize the ~0.35 us/step cost)."""
    if n <= 128:
        return n                                   # one block covers all rows
    k_pad = _round_up(max(k, 1), 128)              # minor dim is lane-padded
    block_budget = (4 if num_cores >= 2 else 2) * _MiB
    budget_elems = block_budget // max(in_bytes, 1)
    tile = min(max(budget_elems // k_pad, 128), n)
    tile = max(128, (tile // 128) * 128)           # multiple of 128 rows
    if num_cores >= 2 and n > 256:
        # keep at least 2 tiles so both v7x TensorCores get work
        half = max(128, (((n + 1) // 2) // 128) * 128)
        tile = min(tile, half)
    return tile


def _vmem_limit_bytes(tile_n, k, in_bytes, vmem_cap):
    """Scoped-VMEM limit: 2 inputs x 2 pipeline buffers + f32 intermediates
    (incl. the materialized contrib MXU operand) + margin; clamped per
    generation (<=40 MiB on 64-MiB v7x, <=48 MiB on 128-MiB v5e/v6e)."""
    k_pad = _round_up(max(k, 1), 128)
    blk = tile_n * k_pad
    est = 4 * blk * in_bytes + 6 * blk * 4 + 2 * _MiB
    cap = min(48 * _MiB, (vmem_cap * 5) // 8)
    return int(min(cap, max(32 * _MiB, est)))


# ---------------------------------------------------------------------------
# Kernel bodies
# ---------------------------------------------------------------------------

def _row_loss_lane_dense(x_ref, t_ref, w_ref):
    """Per-row soft-CE losses for one (tile_n, k) block, returned lane-dense
    as a (1, tile_n) f32 row; the k-reduction runs on the (otherwise idle)
    MXU via a ones-row dot so no (tile_n,1)->(1,tile_n) relayout is needed."""
    x = x_ref[...].astype(jnp.float32)                         # (tile_n, k)
    t = t_ref[...].astype(jnp.float32)                         # (tile_n, k)
    # TODO(synk): with bf16 inputs on v6e/v7x the weight multiply could stay
    # in bf16 (v5e has no bf16 VPU), upcasting only the reduced row.
    tw = t * w_ref[...].astype(jnp.float32) if w_ref is not None else t

    # numerically-stable log-sum-exp per row
    m = jnp.max(x, axis=-1, keepdims=True)                              # (tile_n, 1)
    lse = jnp.log(jnp.sum(jnp.exp(x - m), axis=-1, keepdims=True)) + m  # (tile_n, 1)

    # loss[i] = sum_k tw[i,k] * (lse[i] - x[i,k])  == sum(tw)*lse - sum(tw*x)
    contrib = tw * (lse - x)                                            # (tile_n, k)
    ones_row = jnp.ones((1, contrib.shape[-1]), jnp.float32)
    loss_row = lax.dot_general(
        ones_row, contrib, (((1,), (1,)), ((), ())),
        precision=lax.Precision.HIGHEST,       # keep contrib exact (see TODO)
        preferred_element_type=jnp.float32)                             # (1, tile_n)
    return loss_row


def _none_kernel(*refs, n_rows, tile_n, has_weight, need_mask):
    """reduction='none': per-row losses written as a lane-dense (1, tile_n) row."""
    if has_weight:
        x_ref, t_ref, w_ref, out_ref = refs
    else:
        x_ref, t_ref, out_ref = refs
        w_ref = None

    loss_row = _row_loss_lane_dense(x_ref, t_ref, w_ref)
    if need_mask:
        # Zero rows past the end of the ragged last block (also kills any
        # NaN/Inf coming from the padded garbage rows; NaNs stay in their lane).
        col = lax.broadcasted_iota(jnp.int32, loss_row.shape, 1)
        row_idx = pl.program_id(0) * tile_n + col
        loss_row = jnp.where(row_idx < n_rows, loss_row, 0.0)
    out_ref[...] = loss_row


def _reduce_kernel(*refs, n_rows, tile_n, tiles_per_core, has_weight,
                   split, need_mask):
    """reduction='mean'/'sum': accumulate lane-dense per-row partial sums into
    the resident (1, tile_n) output block; final collapse happens in the wrapper."""
    if has_weight:
        x_ref, t_ref, w_ref, out_ref = refs
    else:
        x_ref, t_ref, out_ref = refs
        w_ref = None

    if split:                      # v7x: leading "parallel" axis = 2 TensorCores
        c = pl.program_id(0)
        j = pl.program_id(1)
    else:                          # v5e/v6e: single sequential reduction axis
        c = 0
        j = pl.program_id(0)

    @pl.when(j == 0)
    def _():
        out_ref[...] = jnp.zeros_like(out_ref)

    loss_row = _row_loss_lane_dense(x_ref, t_ref, w_ref)        # (1, tile_n)

    if need_mask:
        # Mask rows outside [0, n_rows): covers the ragged last block and the
        # clamped duplicate block of the core split (split case only).
        logical_tile = c * tiles_per_core + j
        col = lax.broadcasted_iota(jnp.int32, loss_row.shape, 1)
        row_idx = logical_tile * tile_n + col
        loss_row = jnp.where(row_idx < n_rows, loss_row, 0.0)

    out_ref[...] += loss_row.reshape(out_ref.shape)


# ---------------------------------------------------------------------------
# Wrapper
# ---------------------------------------------------------------------------

def soft_cross_entropy_loss(logits, target, weight=None, reduction="mean",
                            tile_n=None):
    """Pallas implementation of SoftCrossEntropyLoss.forward.

    logits: [n, k] float prediction logits
    target: [n, k] float target probabilities
    weight: optional [k] per-class weights
    """
    n, k = logits.shape
    assert target.shape == (n, k)
    has_weight = weight is not None

    num_cores, vmem_cap = _chip_info()
    in_bytes = max(jnp.dtype(logits.dtype).itemsize,
                   jnp.dtype(target.dtype).itemsize)
    if tile_n is None:
        tile_n = _pick_tile_n(n, k, in_bytes, num_cores)
    num_tiles = pl.cdiv(n, tile_n)
    vmem_limit = _vmem_limit_bytes(tile_n, k, in_bytes, vmem_cap)

    operands = [logits, target]
    if has_weight:
        operands.append(jnp.asarray(weight, jnp.float32).reshape(1, k))

    if reduction == "none":
        in_specs = [pl.BlockSpec((tile_n, k), lambda i: (i, 0)),
                    pl.BlockSpec((tile_n, k), lambda i: (i, 0))]
        if has_weight:
            in_specs.append(pl.BlockSpec((1, k), lambda i: (0, 0)))
        kernel = functools.partial(_none_kernel, n_rows=n, tile_n=tile_n,
                                   has_weight=has_weight,
                                   need_mask=(n % tile_n != 0))
        out = pl.pallas_call(
            kernel,
            out_shape=jax.ShapeDtypeStruct((1, num_tiles * tile_n), jnp.float32),
            grid=(num_tiles,),
            in_specs=in_specs,
            out_specs=pl.BlockSpec((1, tile_n), lambda i: (0, i)),
            compiler_params=pltpu.CompilerParams(
                dimension_semantics=("parallel",),
                vmem_limit_bytes=vmem_limit),
        )(*operands)
        return out[0, :n]

    elif reduction in ("mean", "sum"):
        split = (num_cores >= 2) and (num_tiles >= 2)

        if split:
            tiles_per_core = pl.cdiv(num_tiles, num_cores)

            def row_map(c, j):
                # clamp so the (possibly duplicated) extra step of the last
                # core stays in-bounds; its rows are masked inside the kernel.
                return (jnp.minimum(c * tiles_per_core + j, num_tiles - 1), 0)

            in_specs = [pl.BlockSpec((tile_n, k), row_map),
                        pl.BlockSpec((tile_n, k), row_map)]
            if has_weight:
                in_specs.append(pl.BlockSpec((1, k), lambda c, j: (0, 0)))
            out_shape = jax.ShapeDtypeStruct((num_cores, 1, tile_n), jnp.float32)
            out_spec = pl.BlockSpec((1, 1, tile_n), lambda c, j: (c, 0, 0))
            grid = (num_cores, tiles_per_core)
            semantics = ("parallel", "arbitrary")
            need_mask = (n % tile_n != 0) or (num_tiles % num_cores != 0)
        else:
            tiles_per_core = num_tiles
            in_specs = [pl.BlockSpec((tile_n, k), lambda j: (j, 0)),
                        pl.BlockSpec((tile_n, k), lambda j: (j, 0))]
            if has_weight:
                in_specs.append(pl.BlockSpec((1, k), lambda j: (0, 0)))
            out_shape = jax.ShapeDtypeStruct((1, tile_n), jnp.float32)
            out_spec = pl.BlockSpec((1, tile_n), lambda j: (0, 0))
            grid = (num_tiles,)
            semantics = ("arbitrary",)
            need_mask = (n % tile_n != 0)

        kernel = functools.partial(_reduce_kernel, n_rows=n, tile_n=tile_n,
                                   tiles_per_core=tiles_per_core,
                                   has_weight=has_weight, split=split,
                                   need_mask=need_mask)
        partials = pl.pallas_call(
            kernel,
            out_shape=out_shape,
            grid=grid,
            in_specs=in_specs,
            out_specs=out_spec,
            compiler_params=pltpu.CompilerParams(
                dimension_semantics=semantics,
                vmem_limit_bytes=vmem_limit),
        )(*operands)
        total = jnp.sum(partials)
        if reduction == "mean":
            total = total / n
        return total

    else:
        raise ValueError(f"Unrecognized reduction: {reduction}")


# ---------------------------------------------------------------------------
# Pure-JAX reference and demo
# ---------------------------------------------------------------------------

def _reference(logits, target, weight, reduction):
    logp = jax.nn.log_softmax(logits.astype(jnp.float32), axis=-1)
    if weight is None:
        per_row = jnp.sum(target * (-logp), axis=-1)
    else:
        per_row = jnp.sum(target * weight[None, :] * (-logp), axis=-1)
    if reduction == "none":
        return per_row
    if reduction == "mean":
        return per_row.mean()
    return per_row.sum()


if __name__ == "__main__":
    key = jax.random.PRNGKey(0)
    k1, k2, k3, k4 = jax.random.split(key, 4)

    # --- small config: n=16 examples, k=8 classes, with class weights --------
    n, k = 16, 8
    logits = jax.random.normal(k1, (n, k), dtype=jnp.float32)
    target = jax.nn.softmax(jax.random.normal(k2, (n, k), dtype=jnp.float32),
                            axis=-1)
    weight = jnp.linspace(0.5, 1.5, k, dtype=jnp.float32)

    loss_mean = soft_cross_entropy_loss(logits, target, weight, "mean")
    loss_sum = soft_cross_entropy_loss(logits, target, weight, "sum")
    loss_none = soft_cross_entropy_loss(logits, target, weight, "none")
    jax.block_until_ready((loss_mean, loss_sum, loss_none))

    assert jnp.allclose(loss_mean, _reference(logits, target, weight, "mean"),
                        rtol=1e-4, atol=1e-5)
    assert jnp.allclose(loss_sum, _reference(logits, target, weight, "sum"),
                        rtol=1e-4, atol=1e-5)
    assert jnp.allclose(loss_none, _reference(logits, target, weight, "none"),
                        rtol=1e-4, atol=1e-5)

    # --- ragged config: n not a multiple of the tile, no class weights -------
    n2, kk = 300, 256
    logits2 = jax.random.normal(k3, (n2, kk), dtype=jnp.float32)
    target2 = jax.nn.softmax(jax.random.normal(k4, (n2, kk), dtype=jnp.float32),
                             axis=-1)

    l2_mean = soft_cross_entropy_loss(logits2, target2, None, "mean")
    l2_sum = soft_cross_entropy_loss(logits2, target2, None, "sum")
    l2_none = soft_cross_entropy_loss(logits2, target2, None, "none")
    jax.block_until_ready((l2_mean, l2_sum, l2_none))

    assert jnp.allclose(l2_mean, _reference(logits2, target2, None, "mean"),
                        rtol=1e-4, atol=1e-5)
    assert jnp.allclose(l2_sum, _reference(logits2, target2, None, "sum"),
                        rtol=1e-4, atol=1e-3)
    assert jnp.allclose(l2_none, _reference(logits2, target2, None, "none"),
                        rtol=1e-4, atol=1e-4)

    print("KERNEL_OK")
</pallas_src>

<mosaic_0001>
module attributes {stable_mosaic.version = 11 : i64} {
  func.func @_reduce_kernel(%arg0: i32, %arg1: memref<16x8xf32, #tpu.memory_space<vmem>>, %arg2: memref<16x8xf32, #tpu.memory_space<vmem>>, %arg3: memref<1x8xf32, #tpu.memory_space<vmem>>, %arg4: memref<1x16xf32, #tpu.memory_space<vmem>>) attributes {dimension_semantics = [#tpu.dimension_semantics<arbitrary>], iteration_bounds = array<i64: 1>, scalar_prefetch = 0 : i64, scratch_operands = 0 : i64, tpu.core_type = #tpu.core_type<tc>, window_params = [{transform_indices = @transform_0, window_bounds = array<i64: 16, 8>}, {transform_indices = @transform_1, window_bounds = array<i64: 16, 8>}, {pipeline_mode = #tpu.pipeline_mode<synchronous>, transform_indices = @transform_2, window_bounds = array<i64: 1, 8>}, {pipeline_mode = #tpu.pipeline_mode<synchronous>, transform_indices = @transform_3, window_bounds = array<i64: 1, 16>}]} {
    %c0_i32 = arith.constant 0 : i32
    %0 = arith.cmpi eq, %arg0, %c0_i32 : i32
    %1 = arith.extui %0 : i1 to i32
    %c0_i32_0 = arith.constant 0 : i32
    %2 = arith.cmpi ne, %1, %c0_i32_0 : i32
    scf.if %2 {
      %cst_13 = arith.constant 0.000000e+00 : f32
      %25 = vector.broadcast %cst_13 : f32 to vector<1x16xf32>
      %c0_14 = arith.constant 0 : index
      %c0_15 = arith.constant 0 : index
      %26 = vector.load %arg4[%c0_14, %c0_15] : memref<1x16xf32, #tpu.memory_space<vmem>>, vector<1x16xf32>
      tpu.vector_store %arg4[%c0_14, %c0_15], %25 {strides = array<i32>} : memref<1x16xf32, #tpu.memory_space<vmem>>, vector<1x16xf32>,
    } else {
    }
    %c0 = arith.constant 0 : index
    %c0_1 = arith.constant 0 : index
    %3 = vector.load %arg1[%c0, %c0_1] : memref<16x8xf32, #tpu.memory_space<vmem>>, vector<16x8xf32>
    %c0_2 = arith.constant 0 : index
    %c0_3 = arith.constant 0 : index
    %4 = vector.load %arg2[%c0_2, %c0_3] : memref<16x8xf32, #tpu.memory_space<vmem>>, vector<16x8xf32>
    %c0_4 = arith.constant 0 : index
    %c0_5 = arith.constant 0 : index
    %5 = vector.load %arg3[%c0_4, %c0_5] : memref<1x8xf32, #tpu.memory_space<vmem>>, vector<1x8xf32>
    %6 = vector.broadcast %5 : vector<1x8xf32> to vector<16x8xf32>
    %7 = arith.mulf %4, %6 : vector<16x8xf32>
    %cst = arith.constant dense<0xFF800000> : vector<16xf32>
    %8 = vector.multi_reduction <maximumf>, %3, %cst [1] : vector<16x8xf32> to vector<16xf32>
    %9 = vector.shape_cast %8 : vector<16xf32> to vector<16x1xf32>
    %10 = vector.broadcast %9 : vector<16x1xf32> to vector<16x8xf32>
    %11 = arith.subf %3, %10 : vector<16x8xf32>
    %12 = math.exp %11 : vector<16x8xf32>
    %cst_6 = arith.constant dense<0.000000e+00> : vector<16xf32>
    %13 = vector.multi_reduction <add>, %12, %cst_6 [1] : vector<16x8xf32> to vector<16xf32>
    %14 = vector.shape_cast %13 : vector<16xf32> to vector<16x1xf32>
    %15 = math.log %14 : vector<16x1xf32>
    %16 = arith.addf %15, %9 : vector<16x1xf32>
    %17 = vector.broadcast %16 : vector<16x1xf32> to vector<16x8xf32>
    %18 = arith.subf %17, %3 : vector<16x8xf32>
    %19 = arith.mulf %7, %18 : vector<16x8xf32>
    %cst_7 = arith.constant 1.000000e+00 : f32
    %20 = vector.broadcast %cst_7 : f32 to vector<1x8xf32>
    %cst_8 = arith.constant dense<0.000000e+00> : vector<1x16xf32>
    %21 = tpu.matmul %20, %19, %cst_8 {dimension_numbers = #tpu.dot_dimension_numbers<[1], [1], [0], [0], [0, 0, 1, 0], [], []>, precision = #tpu.contract_precision<fp32>} : vector<1x8xf32>, vector<16x8xf32>, vector<1x16xf32> -> vector<1x16xf32>
    %c0_9 = arith.constant 0 : index
    %c0_10 = arith.constant 0 : index
    %22 = vector.load %arg4[%c0_9, %c0_10] : memref<1x16xf32, #tpu.memory_space<vmem>>, vector<1x16xf32>
    %23 = arith.addf %22, %21 : vector<1x16xf32>
    %c0_11 = arith.constant 0 : index
    %c0_12 = arith.constant 0 : index
    %24 = vector.load %arg4[%c0_11, %c0_12] : memref<1x16xf32, #tpu.memory_space<vmem>>, vector<1x16xf32>
    tpu.vector_store %arg4[%c0_11, %c0_12], %23 {strides = array<i32>} : memref<1x16xf32, #tpu.memory_space<vmem>>, vector<1x16xf32>,
    return
  }
  func.func @transform_0(%arg0: i32) -> (i32, i32) {
    %c0_i32 = arith.constant 0 : i32
    %c0_i32_0 = arith.constant 0 : i32
    return %arg0, %c0_i32 : i32, i32
  }
  func.func @transform_1(%arg0: i32) -> (i32, i32) {
    %c0_i32 = arith.constant 0 : i32
    %c0_i32_0 = arith.constant 0 : i32
    return %arg0, %c0_i32 : i32, i32
  }
  func.func @transform_2(%arg0: i32) -> (i32, i32) {
    %c0_i32 = arith.constant 0 : i32
    %c0_i32_0 = arith.constant 0 : i32
    %c0_i32_1 = arith.constant 0 : i32
    return %c0_i32, %c0_i32_0 : i32, i32
  }
  func.func @transform_3(%arg0: i32) -> (i32, i32) {
    %c0_i32 = arith.constant 0 : i32
    %c0_i32_0 = arith.constant 0 : i32
    %c0_i32_1 = arith.constant 0 : i32
    return %c0_i32, %c0_i32_0 : i32, i32
  }
}

</mosaic_0001>

<bundles_post_ra>
// kernel: tpu_custom_call.1
= control target key start
LH: loop header
LB: loop body
LE: loop exit
PB: predicated region body
PF: predicated region fallthrough
CT: control target
= control target key end

     0   :  { %vm34_vm0 = vcmask 64512   ;;  %s728_s0 = inlined_call_operand.vmem [shape: f32[16,8], index: 0, kind: input, shape index: {}]   ;;  %s729_s1 = inlined_call_operand.vmem [shape: f32[16,8], index: 1, kind: input, shape index: {}]   ;;  %s730_s2 = inlined_call_operand.vmem [shape: f32[1,8], index: 2, kind: input, shape index: {}]   ;;  %s731_s3 = inlined_call_operand.hbm [shape: f32[1,16], index: 3, kind: output, shape index: {}]  }
   0x1   :  { %v22_v0 = vld [vmem:[%s728_s0 + $0x8] sm:$0xff]  ;;  %v21_v1 = vld [vmem:[%s728_s0] sm:$0xff] }
   0x2   :  { %8 = vsyncpa [#allocation3], 0  ;;  %v38_v2 = vsel %vm34_vm0, %v22_v0, -inf  ;;  %v35_v3 = vsel %vm34_vm0, %v21_v1, -inf  ;;  %v648_v14 = vmov 0.0   ;;  %vm649_vm1 = vmmov 0  }
   0x3   :  { %39 = vmax.xlane.f32.xlu0 %v38_v2  ;;  %571 = vmatprep.subr.mxu0 %v648_v14  ;;  %v24_v18 = vld [vmem:[%s729_s1 + $0x8] sm:$0xff]  ;;  %v549_v19 = vld [vmem:[%s730_s2] ss:$0 sm:$0xff]  ;;  %v650_v20 = vmov 0   ;;  %v651_v50 = vmov 1.0   ;;  %vm19_vm2 = vcmask 122880  }
   0x4   :  { %578 = vmatprep.subr.mxu1 %v648_v14  ;;  %575 = vmatprep.mubr.msk.f32.mxu0 %vm649_vm1, %v648_v14  ;;  %v64_v21 = vsel %vm34_vm0, 1.0, %v650_v20  ;;  %v33_v23 = vmul.f32 %v549_v19, %v24_v18  ;;  %v23_v27 = vld [vmem:[%s729_s1] sm:$0xff]  ;;  %20 = vst.msk [vmem:[#allocation2] sm:$0x1] %vm19_vm2, %v648_v14  ;;  %s652_s1 = smov [#allocation2]  }
   0x5   :  { %582 = vmatprep.mubr.msk.f32.mxu1 %vm649_vm1, %v648_v14  ;;  %v140_v25 = vsub.f32 %v64_v21, %v64_v21  ;;  %v32_v31 = vmul.f32 %v549_v19, %v23_v27  ;;  %s541_s2 = sshll.u32 %s652_s1, 4  ;;  %s542_s2 = int_to_ptr.vmem [resolvable:$true] %s541_s2 }
   0x6   :  { %s626_s21 = scalar_lea.vmem %s542_s2, 16  ;;  %s630_s22 = scalar_lea.vmem %s542_s2, 32 }
   0x7   :  { %36 = vmax.xlane.f32.xlu0 %v35_v3  ;;  %v141_v33 = vand.u32 4294901760, %v140_v25  ;;  %p627_p0 = scmp.ne.s32.totalorder %s542_s2, %s626_s21  ;;  %p631_p1 = scmp.lt.s32.totalorder %s542_s2, %s542_s2 }
   0x8   :  { %p632_p2 = scmp.lt.s32.totalorder %s630_s22, %s626_s21 }
   0x9   :  { %v142_v38 = vsub.f32 %v140_v25, %v141_v33 }
   0xa   :  { %p633_p3 = por %p632_p2, %p631_p1 }
   0xb   :  { %v143_v43 = vand.u32 4294901760, %v142_v38  ;;  %v531_v2 = vld [vmem:[#allocation2] sm:$0x1] }
   0xc   :  { %p634_p4 = pnand %p633_p3, %p627_p0 }
  0x8c   :  { %v40_v4 = vpop.xlane.xlu0 %39 }
  0x8d   :  { %v42_v5 = vsub.f32 %v22_v0, %v40_v4 }
  0x8f   :  { %v45_v6 = vmul.f32 1.442695, %v42_v5 }
  0x90   :  { %v37_v7 = vpop.xlane.xlu0 %36 }
  0x91   :  { %618 = vpow2.f32 %v45_v6  ;;  %v41_v8 = vsub.f32 %v21_v1, %v37_v7 }
  0x93   :  { %v43_v9 = vmul.f32 1.442695, %v41_v8 }
  0x95   :  { %620 = vpow2.f32 %v43_v9 }
  0x9e   :  { %v619_v10 = vpop.eup %618 }
  0x9f   :  { %v50_v11 = vsel %vm34_vm0, %v619_v10, 0.0 }
  0xa0   :  { %51 = vadd.xlane.f32.xlu1 %v50_v11 }
  0xa2   :  { %v621_v12 = vpop.eup %620 }
  0xa3   :  { %v47_v13 = vsel %vm34_vm0, %v621_v12, 0.0 }
  0xa4   :  { %48 = vadd.xlane.f32.xlu1 %v47_v13 }
 0x129   :  { %v52_v15 = vpop.xlane.xlu1 %51 }
 0x12a   :  { %622 = vlog2.f32 %v52_v15 }
 0x12d   :  { %v49_v16 = vpop.xlane.xlu1 %48 }
 0x12e   :  { %624 = vlog2.f32 %v49_v16 }
 0x137   :  { %v623_v17 = vpop.eup %622 }
 0x138   :  { %v56_v22 = vmul.f32 0.6931472, %v623_v17 }
 0x13a   :  { %v58_v24 = vadd.f32 %v56_v22, %v40_v4 }
 0x13b   :  { %v625_v26 = vpop.eup %624 }
 0x13c   :  { %v60_v28 = vsub.f32 %v58_v24, %v22_v0  ;;  %v54_v29 = vmul.f32 0.6931472, %v625_v26 }
 0x13e   :  { %v62_v30 = vmul.f32 %v60_v28, %v33_v23  ;;  %v57_v32 = vadd.f32 %v54_v29, %v37_v7 }
 0x140   :  { %v59_v34 = vsub.f32 %v57_v32, %v21_v1  ;;  %v70_v35 = vsel %vm34_vm0, %v62_v30, 0 }
 0x141   :  { %v101_v36 = vand.u32 4294901760, %v70_v35 }
 0x142   :  { %v61_v37 = vmul.f32 %v59_v34, %v32_v31 }
 0x143   :  { %572 = vmatpush3.xpose.msra.mxu0 %v101_v36  ;;  %v179_v39 = vsub.f32 %v70_v35, %v101_v36 }
 0x144   :  { %573 = vmatprep.subr.mxu0 %v648_v14  ;;  %v67_v40 = vsel %vm34_vm0, %v61_v37, 0 }
 0x145   :  { %v104_v41 = vand.u32 4294901760, %v67_v40  ;;  %v180_v42 = vand.u32 4294901760, %v179_v39 }
 0x147   :  { %574 = vmatpush3.xpose.msra.mxu0 %v104_v41  ;;  %v181_v44 = vsub.f32 %v179_v39, %v180_v42  ;;  %v186_v45 = vsub.f32 %v67_v40, %v104_v41 }
 0x148   :  { %585 = vmatprep.subr.mxu0 %v648_v14 }
 0x149   :  { %v182_v46 = vand.u32 4294901760, %v181_v44  ;;  %v187_v47 = vand.u32 4294901760, %v186_v45 }
 0x14a   :  { %576 = vmatmul.mubr.f32.vlgmr.msra.gmra.mxu0 %v143_v43 }
 0x14b   :  { %579 = vmatpush3.xpose.msra.mxu1 %v182_v46  ;;  %586 = vmatpush3.xpose.msra.mxu0 %v179_v39  ;;  %v188_v48 = vsub.f32 %v186_v45, %v187_v47 }
 0x14c   :  { %580 = vmatprep.subr.mxu1 %v648_v14  ;;  %587 = vmatprep.subr.mxu0 %v648_v14 }
 0x14d   :  { %v189_v49 = vand.u32 4294901760, %v188_v48  ;;  %589 = vmatprep.mubr.msk.f32.mxu0 %vm649_vm1, %v648_v14 }
 0x14f   :  { %581 = vmatpush3.xpose.msra.mxu1 %v189_v49  ;;  %588 = vmatpush3.xpose.msra.mxu0 %v186_v45 }
 0x150   :  { %592 = vmatprep.subr.mxu1 %v648_v14  ;;  %599 = vmatprep.subr.mxu0 %v648_v14 }
 0x152   :  { %583 = vmatmul.mubr.msk.f32.vlgmr.msra.gmra.mxu1 %vm34_vm0, %v651_v50  ;;  %590 = vmatmul.mubr.f32.vlgmr.msra.gmra.mxu0 %v140_v25 }
 0x153   :  { %593 = vmatpush3.xpose.msra.mxu1 %v101_v36  ;;  %600 = vmatpush3.xpose.msra.mxu0 %v180_v42 }
 0x154   :  { %594 = vmatprep.subr.mxu1 %v648_v14  ;;  %601 = vmatprep.subr.mxu0 %v648_v14 }
 0x155   :  { %596 = vmatprep.mubr.msk.f32.mxu1 %vm649_vm1, %v648_v14  ;;  %603 = vmatprep.mubr.msk.f32.mxu0 %vm649_vm1, %v648_v14 }
 0x157   :  { %595 = vmatpush3.xpose.msra.mxu1 %v104_v41  ;;  %602 = vmatpush3.xpose.msra.mxu0 %v187_v47 }
 0x158   :  { %606 = vmatprep.subr.mxu1 %v648_v14 }
 0x15a   :  { %597 = vmatmul.mubr.f32.vlgmr.msra.gmra.mxu1 %v141_v33  ;;  %604 = vmatmul.mubr.msk.f32.vlgmr.msra.gmra.mxu0 %vm34_vm0, %v651_v50 }
 0x15b   :  { %607 = vmatpush3.xpose.msra.mxu1 %v101_v36  ;;  %610 = vmatprep.mubr.msk.f32.mxu1 %vm649_vm1, %v648_v14 }
 0x15c   :  { %608 = vmatprep.subr.mxu1 %v648_v14 }
 0x15f   :  { %609 = vmatpush3.xpose.msra.mxu1 %v104_v41 }
 0x162   :  { %611 = vmatmul.mubr.msk.f32.vlgmr.msra.gmra.mxu1 %vm34_vm0, %v651_v50 }
 0x20a   :  { %v145_v51 = vpop.f32.mrf.mxu0 }
 0x20c   :  { %v577_v52 = vpop.f32.mrf.mxu0 }
 0x212   :  { %v226_v53 = vpop.f32.mrf.mxu1  ;;  %v302_v54 = vpop.f32.mrf.mxu0 }
 0x213   :  { %v227_v57 = vadd.f32 %v226_v53, %v145_v51 }
 0x214   :  { %v584_v55 = vpop.f32.mrf.mxu1  ;;  %v591_v56 = vpop.f32.mrf.mxu0 }
 0x215   :  { %v303_v60 = vadd.f32 %v302_v54, %v227_v57 }
 0x21a   :  { %v377_v58 = vpop.f32.mrf.mxu1  ;;  %v454_v59 = vpop.f32.mrf.mxu0 }
 0x21b   :  { %v378_v63 = vadd.f32 %v377_v58, %v303_v60 }
 0x21c   :  { %v598_v61 = vpop.f32.mrf.mxu1  ;;  %v605_v62 = vpop.f32.mrf.mxu0 }
 0x21d   :  { %v455_v0 = vadd.f32 %v454_v59, %v378_v63 }
 0x222   :  { %v527_v1 = vpop.f32.mrf.mxu1 }
 0x223   :  { %v528_v3 = vadd.f32 %v527_v1, %v455_v0 }
 0x224   :  { %v612_v4 = vpop.f32.mrf.mxu1 }
 0x225   :  { %v532_v5 = vadd.f32 %v531_v2, %v528_v3 }
 0x227   :  { %534 = vst.msk [vmem:[#allocation2] sm:$0x1] %vm19_vm2, %v532_v5 }
 0x228   :  { %637 = shalt.err (!%p634_p4)
}
 0x229   :  { %544 = dma.vmem_to_hbm [thread:$0]  %s542_s2, 16, %s731_s3, [#allocation3]  }
 0x22a   :  { %646 = dma.done.wait [#allocation3], 16  }
 0x22b   :  { %647 = vsyncadd [#allocation3], 4294967280 }
 0x22c   :  { %548 = vsyncpa [#allocation3], 1 }

</bundles_post_ra>
